<compile_context>
chip_gen: v7x
topology: tpu7x:2x2x1
jax: 0.10.0
libtpu: 0.0.40
codegen_flags: <defaults>
</compile_context>

<pallas_src>
import numpy as np
import jax
import jax.numpy as jnp
from jax import lax
from jax.experimental import pallas as pl
from jax.experimental.pallas import tpu as pltpu


# --------------------------------------------------------------------------------------
# chip-aware VMEM budgeting
# --------------------------------------------------------------------------------------
def _pad(x, m):
    return ((x + m - 1) // m) * m


def _vmem_capacity_bytes():
    """Physical VMEM per TensorCore (v5e/v6e 128 MiB, v7x 64 MiB), best effort."""
    try:
        info = pltpu.get_tpu_info()
        for attr in ("vmem_capacity_bytes", "vmem_bytes", "vmem_size_bytes"):
            v = getattr(info, attr, None)
            if isinstance(v, (int, np.integer)) and int(v) > 0:
                return int(v)
    except Exception:
        pass
    try:
        kind = jax.devices()[0].device_kind.lower()
        if any(t in kind for t in ("v4", "v5", "v6")):
            return 128 << 20
    except Exception:
        pass
    return 64 << 20  # conservative default (v7x per-TC VMEM)


_VMEM_CAP = _vmem_capacity_bytes()
# explicit scoped-VMEM limit for every pallas_call (v5e default is only 16 MiB)
_VMEM_LIMIT_BYTES = int(max(min(_VMEM_CAP - (8 << 20), 100 << 20), 16 << 20))
# per-grid-step working-set target (double buffers + outputs + intermediates),
# with headroom for compiler scratch / regalloc.
_STEP_BUDGET_BYTES = int(0.70 * _VMEM_LIMIT_BYTES)


def _mosaic_params(dims):
    return pltpu.CompilerParams(dimension_semantics=dims,
                                vmem_limit_bytes=_VMEM_LIMIT_BYTES)


def _pick_row_block(rows, per_row_bytes, const_bytes, budget):
    """Largest row block (divisor of `rows`, multiple of 8, or full) within budget."""
    max_rows = max(8, (budget - const_bytes) // max(per_row_bytes, 1))
    max_rows = int(min(max_rows, 4096))          # diminishing returns past a few K rows
    if rows <= max_rows:
        return rows
    best = None
    d = 8
    while d <= max_rows:
        if rows % d == 0:
            best = d
        d += 8
    return best if best is not None else rows    # fallback: full array block


def _pick_bb(B, N, S, D, F, P, budget):
    """Batch elements per pair-kernel grid step (byte-accurate working-set model)."""
    Dp, Fp = _pad(D, 128), _pad(F, 128)
    Np = _pad(N, 128)
    N8, S8, F8 = _pad(N, 8), _pad(S, 8), _pad(F, 8)

    def step_bytes(bb):
        # f32 input blocks (double-buffered by the pipeline), with VMEM tile padding
        ins = 4 * bb * (8 * Dp            # teacher cls probs        (BB,1,D) -> sublane pad 8
                        + 8 * Dp          # student cls log-probs    (BB,1,D)
                        + N8 * Dp         # teacher region probs     (BB,N,D)
                        + F8 * Np         # teacher feats transposed (BB,F,N)
                        + S8 * Dp         # student region log-probs (BB,S,D)
                        + S8 * Fp)        # student feats            (BB,S,F)
        outs = 4 * 8 * 128                # (1,1,8,128) partial-sum block
        # in-kernel f32 intermediates: sim + iota + onehot (BB,S,N), t_indexed (BB,S,D), cls temps
        inter = 4 * bb * (3 * S8 * Np + S8 * Dp + 2 * 8 * Dp)
        return 2 * ins + 2 * outs + inter

    fitting = [bb for bb in range(1, B + 1) if B % bb == 0 and step_bytes(bb) <= budget]
    if not fitting:
        return 1
    # prefer >=2 steps on the parallel (batch) axis (v7x megacore) and >=4 total steps
    tier1 = [bb for bb in fitting if B // bb >= 2 and (B // bb) * P >= 4]
    tier2 = [bb for bb in fitting if (B // bb) * P >= 4]
    pool = tier1 or tier2 or fitting
    return max(pool)


# --------------------------------------------------------------------------------------
# prep kernels
# --------------------------------------------------------------------------------------
def _make_cls_prep_kernel(inv_temp, log_space):
    inv_temp = float(inv_temp)

    def kernel(pred_ref, center_ref, out_ref):
        x = (pred_ref[...].astype(jnp.float32)
             - center_ref[...].astype(jnp.float32)) * inv_temp
        x = x - jnp.max(x, axis=-1, keepdims=True)
        ex = jnp.exp(x)
        denom = jnp.sum(ex, axis=-1, keepdims=True)
        if log_space:
            out_ref[...] = (x - jnp.log(denom)).astype(out_ref.dtype)
        else:
            out_ref[...] = (ex * pl.reciprocal(denom)).astype(out_ref.dtype)

    return kernel


def _cls_prep(pred, center, inv_temp, log_space):
    """pred: [rows, D] -> softmax or log-softmax of (pred - center) * inv_temp."""
    rows, D = pred.shape
    Dp = _pad(D, 128)
    per_row = 4 * (2 * Dp + 2 * Dp + 2 * Dp)       # in x2, out x2, intermediates (x, ex)
    const = 4 * 2 * 8 * Dp                         # center block
    block_rows = _pick_row_block(rows, per_row, const, _STEP_BUDGET_BYTES)
    return pl.pallas_call(
        _make_cls_prep_kernel(inv_temp, log_space),
        out_shape=jax.ShapeDtypeStruct((rows, D), jnp.float32),
        grid=(rows // block_rows,),
        in_specs=[pl.BlockSpec((block_rows, D), lambda r: (r, 0)),
                  pl.BlockSpec((1, D), lambda r: (0, 0))],
        out_specs=pl.BlockSpec((block_rows, D), lambda r: (r, 0)),
        compiler_params=_mosaic_params(("parallel",)),
    )(pred, center)


def _make_region_prep_kernel(inv_temp, log_space):
    inv_temp = float(inv_temp)

    def kernel(pred_ref, feat_ref, center_ref, prob_ref, featn_ref):
        x = (pred_ref[...].astype(jnp.float32)
             - center_ref[...].astype(jnp.float32)) * inv_temp        # (R, D)
        x = x - jnp.max(x, axis=-1, keepdims=True)
        ex = jnp.exp(x)
        denom = jnp.sum(ex, axis=-1, keepdims=True)
        if log_space:
            prob_ref[...] = (x - jnp.log(denom)).astype(prob_ref.dtype)
        else:
            prob_ref[...] = (ex * pl.reciprocal(denom)).astype(prob_ref.dtype)

        f = feat_ref[...].astype(jnp.float32)                          # (R, F)
        ssq = jnp.sum(f * f, axis=-1, keepdims=True)
        # x / max(||x||, 1e-12) == x * rsqrt(max(||x||^2, 1e-24))  (EUP rsqrt)
        featn_ref[...] = (f * lax.rsqrt(jnp.maximum(ssq, 1e-24))).astype(featn_ref.dtype)

    return kernel


def _region_prep(pred, feats, center, inv_temp, log_space):
    """pred: [rows, D], feats: [rows, F] -> ((log-)softmax probs, L2-normalized feats)."""
    rows, D = pred.shape
    F_ = feats.shape[-1]
    Dp, Fp = _pad(D, 128), _pad(F_, 128)
    per_row = 4 * (2 * (Dp + Fp)        # inputs, double-buffered
                   + 2 * (Dp + Fp)      # outputs, double-buffered
                   + 2 * Dp + Fp)       # intermediates (x, ex, f*f)
    const = 4 * 2 * 8 * Dp              # center block
    block_rows = _pick_row_block(rows, per_row, const, _STEP_BUDGET_BYTES)
    return pl.pallas_call(
        _make_region_prep_kernel(inv_temp, log_space),
        out_shape=(jax.ShapeDtypeStruct((rows, D), jnp.float32),
                   jax.ShapeDtypeStruct((rows, F_), jnp.float32)),
        grid=(rows // block_rows,),
        in_specs=[pl.BlockSpec((block_rows, D), lambda r: (r, 0)),
                  pl.BlockSpec((block_rows, F_), lambda r: (r, 0)),
                  pl.BlockSpec((1, D), lambda r: (0, 0))],
        out_specs=(pl.BlockSpec((block_rows, D), lambda r: (r, 0)),
                   pl.BlockSpec((block_rows, F_), lambda r: (r, 0))),
        compiler_params=_mosaic_params(("parallel",)),
    )(pred, feats, center)


# --------------------------------------------------------------------------------------
# fused pair kernel: one grid step = one (teacher crop, student crop) pair x BB batch elems
# --------------------------------------------------------------------------------------
def _pair_kernel(pi_ref,                     # scalar-prefetch (3, P) int32 in SMEM (index_maps only)
                 q_ref, v_ref,               # precomputed cls softmax / log-softmax  (BB,1,D)
                 tr_ref, tft_ref,            # teacher region probs (BB,N,D), feats^T (BB,F,N)
                 sr_ref, sfn_ref,            # student region log-probs (BB,S,D), feats (BB,S,F)
                 out_ref):
    del pi_ref  # only consumed by the BlockSpec index_maps

    # ---------------- CLS term (precomputed softmax / log-softmax) ----------------
    cls_loss = jnp.sum(-q_ref[...].astype(jnp.float32) * v_ref[...].astype(jnp.float32))

    # ---------------- Region term ----------------
    sfn = sfn_ref[...].astype(jnp.float32)          # (BB, S, F) normalized student feats
    tft = tft_ref[...].astype(jnp.float32)          # (BB, F, N) normalized teacher feats (pre-T)
    sim = jnp.einsum('bsf,bfn->bsn', sfn, tft,
                     preferred_element_type=jnp.float32)              # cosine sim (MXU)

    n_cols = sim.shape[-1]
    sim_max = jnp.max(sim, axis=-1, keepdims=True)
    iota_n = lax.broadcasted_iota(jnp.int32, sim.shape, 2)
    # first-occurrence argmax (matches torch .max(dim)[1] tie behaviour)
    # TODO(synk): jnp.argmax lowering would save one reduce/select pass; kept manual for
    #             guaranteed Mosaic lowering.
    idx = jnp.min(jnp.where(sim >= sim_max, iota_n, n_cols), axis=-1, keepdims=True)
    onehot = (iota_n == idx).astype(jnp.float32)                      # (BB, S, N)

    tr = tr_ref[...].astype(jnp.float32)            # (BB, N, D) teacher region probabilities
    # gather of teacher rows by best-match index == one-hot matmul (MXU)
    t_indexed = jnp.einsum('bsn,bnd->bsd', onehot, tr,
                           preferred_element_type=jnp.float32)        # (BB, S, D)

    logsm_sr = sr_ref[...].astype(jnp.float32)      # (BB, S, D) student region log-softmax
    S = logsm_sr.shape[1]
    region_loss = jnp.sum(-t_indexed * logsm_sr) * (1.0 / S)          # sum_b mean_S sum_D

    partial = 0.5 * cls_loss + 0.5 * region_loss                      # sum over BB batch elems
    # lane-dense full-tile (8,128) store: unmasked vst, disjoint block per grid step
    out_ref[...] = partial * jnp.ones(out_ref.shape, jnp.float32)


def _pair_group_loss(pairs, group_offset, q4, v4, tr4, tft4, sr4, sf4):
    """Sum over the given (teacher i, student j) pairs of sum_b per-element pair loss.

    q4:   [2, B, 1, D]    teacher cls softmax (precomputed)
    v4:   [nc, B, 1, D]   student cls log-softmax (precomputed)
    tr4:  [2, B, N, D]    teacher region probs
    tft4: [2, B, F, N]    normalized teacher feats, pre-transposed
    sr4:  [G, B, S, D]    student region log-probs (this crop-size group)
    sf4:  [G, B, S, F]    normalized student feats (this group)
    """
    P = len(pairs)
    _, B, N, D = tr4.shape
    S = sr4.shape[2]
    F_ = sf4.shape[3]
    BB = _pick_bb(B, N, S, D, F_, P, _STEP_BUDGET_BYTES)
    num_bb = B // BB

    info_np = np.zeros((3, P), np.int32)
    for p, (i, j) in enumerate(pairs):
        info_np[0, p] = i                  # teacher crop index           (cls / region / feats)
        info_np[1, p] = j                  # student crop index, global   (cls)
        info_np[2, p] = j - group_offset   # student crop index in group  (region / feats)
    info = jnp.asarray(info_np)

    # Grid (num_bb, P): batch axis outer ("parallel" -> v7x megacore sharding), pair axis
    # inner ("arbitrary", sequential) so consecutive pairs sharing a teacher crop reuse the
    # teacher region/feature blocks (DMA elided when the index_map output repeats).
    out = pl.pallas_call(
        _pair_kernel,
        out_shape=jax.ShapeDtypeStruct((num_bb, P, 8, 128), jnp.float32),
        grid_spec=pltpu.PrefetchScalarGridSpec(
            num_scalar_prefetch=1,
            grid=(num_bb, P),
            in_specs=[
                pl.BlockSpec((None, BB, 1, D),  lambda bb, p, pi: (pi[0, p], bb, 0, 0)),  # q
                pl.BlockSpec((None, BB, 1, D),  lambda bb, p, pi: (pi[1, p], bb, 0, 0)),  # logsm v
                pl.BlockSpec((None, BB, N, D),  lambda bb, p, pi: (pi[0, p], bb, 0, 0)),  # t region
                pl.BlockSpec((None, BB, F_, N), lambda bb, p, pi: (pi[0, p], bb, 0, 0)),  # t featsT
                pl.BlockSpec((None, BB, S, D),  lambda bb, p, pi: (pi[2, p], bb, 0, 0)),  # s region
                pl.BlockSpec((None, BB, S, F_), lambda bb, p, pi: (pi[2, p], bb, 0, 0)),  # s feats
            ],
            out_specs=pl.BlockSpec((1, 1, 8, 128), lambda bb, p, pi: (bb, p, 0, 0)),
        ),
        compiler_params=_mosaic_params(("parallel", "arbitrary")),
    )(info, q4, v4, tr4, tft4, sr4, sf4)

    return jnp.sum(out[:, :, 0, 0])


# --------------------------------------------------------------------------------------
# module wrapper
# --------------------------------------------------------------------------------------
class DDINOLossPallas:
    """JAX / Pallas port of DDINOLoss (single-device forward pass)."""

    def __init__(self, out_dim, ncrops, warmup_teacher_temp, teacher_temp,
                 warmup_teacher_epochs, nepochs, student_temp=0.1, center_momentum=0.9):
        self.student_temp = student_temp
        self.ncrops = ncrops
        self.center_momentum = center_momentum
        self.center = jnp.zeros((1, out_dim), jnp.float32)
        self.center_grid = jnp.zeros((1, out_dim), jnp.float32)
        self.teacher_temp_schedule = np.concatenate(
            (np.linspace(warmup_teacher_temp, teacher_temp, warmup_teacher_epochs),
             np.ones(nepochs - warmup_teacher_epochs) * teacher_temp))

    def __call__(self, student_outputs, teacher_outputs, epoch):
        s_cls_pred, s_region_pred, s_feats, s_npatch = student_outputs
        t_cls_pred, t_region_pred, t_feats, t_npatch = teacher_outputs

        temp = float(self.teacher_temp_schedule[epoch])
        inv_t_temp = 1.0 / temp
        inv_s_temp = 1.0 / float(self.student_temp)

        N = int(t_npatch[0])
        D = t_cls_pred.shape[-1]
        F_ = t_feats.shape[-1]
        B = t_cls_pred.shape[0] // 2
        zero_center = jnp.zeros((1, D), jnp.float32)

        # ---- prep: every per-crop invariant computed exactly once ----
        q_cls = _cls_prep(t_cls_pred, self.center, inv_t_temp, log_space=False)       # teacher softmax
        v_cls = _cls_prep(s_cls_pred, zero_center, inv_s_temp, log_space=True)        # student log-softmax
        t_region_probs, t_feats_n = _region_prep(
            t_region_pred, t_feats, self.center_grid, inv_t_temp, log_space=False)
        s_region_logp, s_feats_n = _region_prep(
            s_region_pred, s_feats, zero_center, inv_s_temp, log_space=True)

        # contiguous reshapes only (matches torch.chunk / torch.split row layout)
        q4 = q_cls.reshape(2, B, 1, D)
        v4 = v_cls.reshape(self.ncrops, B, 1, D)
        tr4 = t_region_probs.reshape(2, B, N, D)
        # pre-transpose teacher feats once so the sim matmul is a plain [S,F]x[F,N] contraction
        tft4 = jnp.swapaxes(t_feats_n.reshape(2, B, N, F_), 2, 3)                      # (2,B,F,N)
        # TODO(synk): optionally store features in bf16 for the sim matmul (native MXU rate);
        #             kept f32 here because bf16 can flip near-tie argmax vs the f32 reference.

        Ng = int(s_npatch[0])
        rows_g = 2 * B * Ng
        sr_g = s_region_logp[:rows_g].reshape(2, B, Ng, D)
        sf_g = s_feats_n[:rows_g].reshape(2, B, Ng, F_)

        # ---- fused pair kernels: one launch per student-crop-size group ----
        pairs_g = [(0, 1), (1, 0)]
        total = _pair_group_loss(pairs_g, 0, q4, v4, tr4, tft4, sr_g, sf_g)
        n_terms = len(pairs_g)

        if self.ncrops > 2:
            Nl = int(s_npatch[1])
            sr_l = s_region_logp[rows_g:].reshape(self.ncrops - 2, B, Nl, D)
            sf_l = s_feats_n[rows_g:].reshape(self.ncrops - 2, B, Nl, F_)
            # order pairs so consecutive steps share the teacher crop (and student crops at the
            # boundary) -> teacher region/feat DMAs reused across consecutive grid steps.
            pairs_l = ([(0, j) for j in range(2, self.ncrops)]
                       + [(1, j) for j in range(self.ncrops - 1, 1, -1)])
            total = total + _pair_group_loss(pairs_l, 2, q4, v4, tr4, tft4, sr_l, sf_l)
            n_terms += len(pairs_l)

        total_loss = total / (n_terms * B)   # per-pair mean over batch, then mean over pairs

        # ---- center EMA update (single device: all_reduce / world_size == identity) ----
        # TODO(synk): torch.distributed.all_reduce has no single-device Pallas equivalent;
        #             multi-device would use jax.lax.psum / a remote-DMA collective.
        m = self.center_momentum
        batch_center = jnp.sum(t_cls_pred, axis=0, keepdims=True) / t_cls_pred.shape[0]
        batch_grid_center = jnp.sum(t_region_pred, axis=0, keepdims=True) / t_region_pred.shape[0]
        self.center = self.center * m + batch_center * (1.0 - m)
        self.center_grid = self.center_grid * m + batch_grid_center * (1.0 - m)
        return total_loss


# ------------------------- pure-JAX reference (for verification) -------------------------
def _ref_forward(student_outputs, teacher_outputs, epoch, center, center_grid,
                 schedule, ncrops, student_temp):
    s_cls_pred, s_region_pred, s_feats, s_npatch = student_outputs
    t_cls_pred, t_region_pred, t_feats, t_npatch = teacher_outputs
    temp = float(schedule[epoch])
    N = int(t_npatch[0])
    D = t_cls_pred.shape[-1]
    F_ = t_feats.shape[-1]

    teacher_cls = jax.nn.softmax((t_cls_pred - center) / temp, axis=-1)
    teacher_cls = jnp.split(teacher_cls, 2, axis=0)
    teacher_region = jax.nn.softmax((t_region_pred - center_grid) / temp, axis=-1)
    teacher_region = jnp.split(teacher_region, 2, axis=0)
    teacher_feats = jnp.split(t_feats, 2, axis=0)
    B = teacher_region[0].shape[0] // N

    student_cls = jnp.split(s_cls_pred / student_temp, ncrops, axis=0)
    split_sizes = [int(s_npatch[0])] * 2 + [int(s_npatch[1])] * (ncrops - 2)
    split_bs = [s * B for s in split_sizes]
    offs = np.cumsum([0] + split_bs)
    s_region_scaled = s_region_pred / student_temp
    student_region = [s_region_scaled[offs[k]:offs[k + 1]] for k in range(ncrops)]
    student_feats = [s_feats[offs[k]:offs[k + 1]] for k in range(ncrops)]

    def normalize(x):
        return x / jnp.maximum(jnp.linalg.norm(x, axis=-1, keepdims=True), 1e-12)

    total, n_terms = 0.0, 0
    for i in range(2):
        q = teacher_cls[i]
        t_region_cur = teacher_region[i].reshape(B, N, D)
        t_fea_cur = teacher_feats[i].reshape(B, N, F_)
        for j in range(ncrops):
            if j == i:
                continue
            v = student_cls[j]
            loss = 0.5 * jnp.sum(-q * jax.nn.log_softmax(v, axis=-1), axis=-1)
            Sj = split_sizes[j]
            s_region_cur = student_region[j].reshape(B, Sj, D)
            s_fea_cur = student_feats[j].reshape(B, Sj, F_)
            sim = jnp.matmul(normalize(s_fea_cur), jnp.swapaxes(normalize(t_fea_cur), 1, 2))
            ind = jnp.argmax(sim, axis=2)
            idx = jnp.broadcast_to(ind[:, :, None], (B, Sj, D))
            t_indexed = jnp.take_along_axis(t_region_cur, idx, axis=1)
            loss = loss + 0.5 * jnp.mean(
                jnp.sum(-t_indexed * jax.nn.log_softmax(s_region_cur, axis=-1), axis=-1), axis=-1)
            total = total + jnp.mean(loss)
            n_terms += 1
    return total / n_terms


if __name__ == "__main__":
    key = jax.random.PRNGKey(0)
    out_dim = 128
    feat_dim = 128
    B = 2
    ncrops = 4
    N_global = 16
    N_local = 8
    student_npatch = (N_global, N_local)
    teacher_npatch = (N_global,)
    epoch = 1

    ks = jax.random.split(key, 6)
    teacher_cls_pred = jax.random.normal(ks[0], (2 * B, out_dim), jnp.float32)
    teacher_region_pred = jax.random.normal(ks[1], (2 * B * N_global, out_dim), jnp.float32)
    teacher_feats = jax.random.normal(ks[2], (2 * B * N_global, feat_dim), jnp.float32)
    n_student_rows = B * (2 * N_global + (ncrops - 2) * N_local)
    student_cls_pred = jax.random.normal(ks[3], (ncrops * B, out_dim), jnp.float32)
    student_region_pred = jax.random.normal(ks[4], (n_student_rows, out_dim), jnp.float32)
    student_feats = jax.random.normal(ks[5], (n_student_rows, feat_dim), jnp.float32)

    student_outputs = (student_cls_pred, student_region_pred, student_feats, student_npatch)
    teacher_outputs = (teacher_cls_pred, teacher_region_pred, teacher_feats, teacher_npatch)

    loss_mod = DDINOLossPallas(out_dim, ncrops,
                               warmup_teacher_temp=0.04, teacher_temp=0.07,
                               warmup_teacher_epochs=2, nepochs=5)

    ref = _ref_forward(student_outputs, teacher_outputs, epoch,
                       jnp.zeros((1, out_dim), jnp.float32),
                       jnp.zeros((1, out_dim), jnp.float32),
                       loss_mod.teacher_temp_schedule, ncrops, 0.1)

    loss = loss_mod(student_outputs, teacher_outputs, epoch)
    loss = jax.block_until_ready(loss)
    ref = jax.block_until_ready(ref)

    assert np.allclose(np.asarray(loss), np.asarray(ref), rtol=1e-3, atol=1e-3), (loss, ref)
    print("KERNEL_OK")
</pallas_src>

<mosaic_0001>
module attributes {stable_mosaic.version = 11 : i64} {
  func.func @kernel(%arg0: i32, %arg1: memref<4x128xf32, #tpu.memory_space<vmem>>, %arg2: memref<1x128xf32, #tpu.memory_space<vmem>>, %arg3: memref<4x128xf32, #tpu.memory_space<vmem>>) attributes {dimension_semantics = [#tpu.dimension_semantics<parallel>], iteration_bounds = array<i64: 1>, scalar_prefetch = 0 : i64, scratch_operands = 0 : i64, tpu.core_type = #tpu.core_type<tc>, window_params = [{transform_indices = @transform_0, window_bounds = array<i64: 4, 128>}, {pipeline_mode = #tpu.pipeline_mode<synchronous>, transform_indices = @transform_1, window_bounds = array<i64: 1, 128>}, {transform_indices = @transform_2, window_bounds = array<i64: 4, 128>}]} {
    %c0 = arith.constant 0 : index
    %c0_0 = arith.constant 0 : index
    %0 = vector.load %arg1[%c0, %c0_0] : memref<4x128xf32, #tpu.memory_space<vmem>>, vector<4x128xf32>
    %c0_1 = arith.constant 0 : index
    %c0_2 = arith.constant 0 : index
    %1 = vector.load %arg2[%c0_1, %c0_2] : memref<1x128xf32, #tpu.memory_space<vmem>>, vector<1x128xf32>
    %2 = vector.broadcast %1 : vector<1x128xf32> to vector<4x128xf32>
    %3 = arith.subf %0, %2 : vector<4x128xf32>
    %cst = arith.constant 14.2857141 : f32
    %4 = vector.broadcast %cst : f32 to vector<4x128xf32>
    %5 = arith.mulf %3, %4 : vector<4x128xf32>
    %cst_3 = arith.constant dense<0xFF800000> : vector<4xf32>
    %6 = vector.multi_reduction <maximumf>, %5, %cst_3 [1] : vector<4x128xf32> to vector<4xf32>
    %7 = vector.shape_cast %6 : vector<4xf32> to vector<4x1xf32>
    %8 = vector.broadcast %7 : vector<4x1xf32> to vector<4x128xf32>
    %9 = arith.subf %5, %8 : vector<4x128xf32>
    %10 = math.exp %9 : vector<4x128xf32>
    %cst_4 = arith.constant dense<0.000000e+00> : vector<4xf32>
    %11 = vector.multi_reduction <add>, %10, %cst_4 [1] : vector<4x128xf32> to vector<4xf32>
    %12 = vector.shape_cast %11 : vector<4xf32> to vector<4x1xf32>
    %13 = tpu.reciprocal %12 : vector<4x1xf32> -> vector<4x1xf32>
    %14 = vector.broadcast %13 : vector<4x1xf32> to vector<4x128xf32>
    %15 = arith.mulf %10, %14 : vector<4x128xf32>
    %c0_5 = arith.constant 0 : index
    %c0_6 = arith.constant 0 : index
    %16 = vector.load %arg3[%c0_5, %c0_6] : memref<4x128xf32, #tpu.memory_space<vmem>>, vector<4x128xf32>
    tpu.vector_store %arg3[%c0_5, %c0_6], %15 {strides = array<i32>} : memref<4x128xf32, #tpu.memory_space<vmem>>, vector<4x128xf32>,
    return
  }
  func.func @transform_0(%arg0: i32) -> (i32, i32) {
    %c0_i32 = arith.constant 0 : i32
    %c0_i32_0 = arith.constant 0 : i32
    return %arg0, %c0_i32 : i32, i32
  }
  func.func @transform_1(%arg0: i32) -> (i32, i32) {
    %c0_i32 = arith.constant 0 : i32
    %c0_i32_0 = arith.constant 0 : i32
    %c0_i32_1 = arith.constant 0 : i32
    return %c0_i32, %c0_i32_0 : i32, i32
  }
  func.func @transform_2(%arg0: i32) -> (i32, i32) {
    %c0_i32 = arith.constant 0 : i32
    %c0_i32_0 = arith.constant 0 : i32
    return %arg0, %c0_i32 : i32, i32
  }
}

</mosaic_0001>

<bundles_post_ra>
// kernel: tpu_custom_call.1
= control target key start
LH: loop header
LB: loop body
LE: loop exit
PB: predicated region body
PF: predicated region fallthrough
CT: control target
= control target key end

     0   :  { %7 = vsyncpa [#allocation3], 0  ;;  %s161_s0 = inlined_call_operand.hbm [shape: f32[4,128], index: 0, kind: input, shape index: {}]   ;;  %s162_s1 = inlined_call_operand.vmem [shape: f32[1,128], index: 1, kind: input, shape index: {}]   ;;  %s163_s2 = inlined_call_operand.hbm [shape: f32[4,128], index: 2, kind: output, shape index: {}]  }
   0x1   :  { %8 = vsyncpa [#allocation4], 0  ;;  %s117_s9 = smov [#allocation2]   ;;  %s69_s13 = scalar_lea.hbm %s161_s0, 64 }
   0x2   :  { %s15_s10 = sshll.u32 %s117_s9, 4  ;;  %p70_p0 = scmp.ne.s32.totalorder %s161_s0, %s69_s13  ;;  %s16_s10 = int_to_ptr.vmem [resolvable:$true] %s15_s10 }
   0x3   :  { %p73_p1 = scmp.lt.u32.totalorder %s69_s13, %s161_s0 }
   0x5   :  { %p75_p2 = pnand %p73_p1, %p70_p0 }
   0x7   :  { %78 = shalt.err (!%p75_p2)
}
   0x8   :  { %s79_s18 = scalar_lea.vmem %s16_s10, 64  ;;  %p84_p4 = scmp.lt.s32.totalorder %s16_s10, %s16_s10 }
   0x9   :  { %p80_p3 = scmp.ne.s32.totalorder %s16_s10, %s79_s18  ;;  %p85_p5 = scmp.lt.s32.totalorder %s79_s18, %s79_s18 }
   0xb   :  { %p86_p6 = por %p85_p5, %p84_p4 }
   0xd   :  { %p87_p7 = pnand %p86_p6, %p80_p3 }
   0xf   :  { %90 = shalt.err (!%p87_p7)
}
  0x10   :  { %18 = dma.hbm_to_vmem [thread:$0]  %s161_s0, 64, %s16_s10, [#allocation3]  }
  0x11   :  { %113 = dma.done.wait [#allocation3], 64  }
  0x12   :  { %114 = vsyncadd [#allocation3], 4294967232  ;;  %v24_v0 = vld [vmem:[#allocation2] sm:$0xf]  ;;  %vm34_vm0 = vcmask 1043456   ;;  %s118_s0 = smov [#allocation5]  }
  0x13   :  { %v62_v1 = vld [vmem:[%s162_s1] ss:$0 sm:$0xff]  ;;  %s53_s23 = sshll.u32 %s118_s0, 4  ;;  %s54_s23 = int_to_ptr.vmem [resolvable:$true] %s53_s23 }
  0x14   :  { %v32_v2 = vsub.f32 %v24_v0, %v62_v1  ;;  %s91_s1 = scalar_lea.vmem %s54_s23, 64  ;;  %p96_p9 = scmp.lt.s32.totalorder %s54_s23, %s54_s23 }
  0x15   :  { %p92_p8 = scmp.ne.s32.totalorder %s54_s23, %s91_s1  ;;  %p97_p10 = scmp.lt.s32.totalorder %s91_s1, %s91_s1 }
  0x16   :  { %v33_v3 = vmul.f32 14.285714, %v32_v2 }
  0x17   :  { %p98_p11 = por %p97_p10, %p96_p9 }
  0x18   :  { %v35_v4 = vsel %vm34_vm0, %v33_v3, -inf }
  0x19   :  { %36 = vmax.xlane.f32.xlu0 %v35_v4  ;;  %p99_p12 = pnand %p98_p11, %p92_p8 }
  0xa6   :  { %v37_v5 = vpop.xlane.xlu0 %36 }
  0xa7   :  { %v38_v6 = vsub.f32 %v33_v3, %v37_v5 }
  0xa9   :  { %v39_v7 = vmul.f32 1.442695, %v38_v6 }
  0xab   :  { %65 = vpow2.f32 %v39_v7 }
  0xb5   :  { %v66_v8 = vpop.eup %65 }
  0xb6   :  { %v41_v9 = vsel %vm34_vm0, %v66_v8, 0.0 }
  0xb7   :  { %42 = vadd.xlane.f32.xlu0 %v41_v9 }
 0x144   :  { %v43_v10 = vpop.xlane.xlu0 %42 }
 0x145   :  { %67 = vrcp.f32 %v43_v10 }
 0x14f   :  { %v68_v11 = vpop.eup %67 }
 0x150   :  { %v45_v12 = vmul.f32 %v68_v11, %v66_v8 }
 0x152   :  { %46 = vst [vmem:[#allocation5] sm:$0xf] %v45_v12 }
 0x153   :  { %102 = shalt.err (!%p99_p12)
}
 0x154   :  { %s103_s26 = scalar_lea.hbm %s163_s2, 64 }
 0x155   :  { %p104_p13 = scmp.ne.s32.totalorder %s163_s2, %s103_s26  ;;  %p107_p0 = scmp.lt.u32.totalorder %s103_s26, %s163_s2 }
 0x157   :  { %p109_p1 = pnand %p107_p0, %p104_p13 }
 0x159   :  { %112 = shalt.err (!%p109_p1)
}
 0x15a   :  { %56 = dma.vmem_to_hbm [thread:$0]  %s54_s23, 64, %s163_s2, [#allocation4]  }
 0x15b   :  { %115 = dma.done.wait [#allocation4], 64  }
 0x15c   :  { %116 = vsyncadd [#allocation4], 4294967232 }
 0x15d   :  { %60 = vsyncpa [#allocation3], 1 }
 0x15e   :  { %61 = vsyncpa [#allocation4], 1 }

</bundles_post_ra>
